<compile_context>
chip_gen: v6e
topology: v6e:2x2x1
jax: 0.10.0
libtpu: 0.0.40
codegen_flags: <defaults>
</compile_context>

<pallas_src>
import functools

import jax
import jax.numpy as jnp
from jax.experimental import pallas as pl
from jax.experimental.pallas import tpu as pltpu


def _conv_stats_kernel(x_ref, w_ref, mask_ref, conv_ref, sum_ref, ssq_ref,
                       *, tap_offsets, t_q):
    # x_ref   : (1, 1, Cin, Tq + max_off)  bf16  flattened padded image window
    # w_ref   : (Cout, KH*KW*Cin)          bf16  folded conv weights
    # mask_ref: (1, 1, Tq)                 f32   1.0 on valid output columns
    # conv_ref: (1, Cout, Tq)              bf16  conv output tile (lane-dense)
    # sum_ref : (Cout, 1)                  f32   per-channel sum   (accumulator)
    # ssq_ref : (Cout, 1)                  f32   per-channel sumsq (accumulator)
    @pl.when((pl.program_id(0) == 0) & (pl.program_id(1) == 0))
    def _init():
        sum_ref[...] = jnp.zeros_like(sum_ref)
        ssq_ref[...] = jnp.zeros_like(ssq_ref)

    x = x_ref[0, 0]                                          # (Cin, Tq + max_off)
    # Build the (KH*KW*Cin, Tq) patch matrix from static lane-offset slices; taps are
    # folded into the contraction dim so the conv is a single MXU push.
    patch = jnp.concatenate([x[:, off:off + t_q] for off in tap_offsets], axis=0)
    acc = jnp.dot(w_ref[...], patch,
                  preferred_element_type=jnp.float32)        # (Cout, Tq) f32
    conv_ref[0] = acc.astype(conv_ref.dtype)                 # bf16 intermediate

    # Training-mode BN statistics (pass 1): masked per-channel sum / sum-of-squares.
    m = mask_ref[0]                                          # (1, Tq)
    masked = acc * m
    sum_ref[...] = sum_ref[...] + jnp.sum(masked, axis=1, keepdims=True)
    ssq_ref[...] = ssq_ref[...] + jnp.sum(masked * acc, axis=1, keepdims=True)


def _bn_lrelu_kernel(conv_ref, csum_ref, cssq_ref, gamma_ref, beta_ref, o_ref,
                     *, inv_count, eps, neg_slope):
    # conv_ref : (1, Cout, Tq) bf16 ; csum/cssq/gamma/beta : (Cout, 1) f32 ; o_ref f32
    mean = csum_ref[...] * inv_count                          # (Cout, 1)
    var = jnp.maximum(cssq_ref[...] * inv_count - mean * mean, 0.0)   # biased variance
    scale = gamma_ref[...] * jax.lax.rsqrt(var + eps)         # tiny; rsqrt -> EUP
    shift = beta_ref[...] - mean * scale
    y = conv_ref[...].astype(jnp.float32) * scale[None] + shift[None]  # per-channel FMA
    o_ref[...] = jnp.where(y > 0, y, neg_slope * y)           # LeakyReLU(0.01)


def simple_conv_forward(x_nchw, w_hwio, bias, gamma, beta, eps=1e-5, neg_slope=0.01):
    del bias  # exactly cancelled by the training-mode BN mean subtraction
    N, Cin, H, W = x_nchw.shape
    KH, KW, _, Cout = w_hwio.shape
    ph, pw = KH // 2, KW // 2
    Hp, Wp = H + 2 * ph, W + 2 * pw

    # Flattened (row-major over the *padded width*) output-column space per image.
    Q = H * Wp                                # valid q range; some columns are garbage
    max_off = (KH - 1) * Wp + (KW - 1)        # largest tap offset in flat coordinates

    # q-tile size (lane axis of the output), rounded up to a multiple of 128 so output
    # stores are unmasked full-lane vst.  NOTE: when gridding large images, budget
    # tiles against v7x's 64 MiB VMEM (roughly half the v5e/v6e choice).
    if Q <= 1024:
        t_q = -(-Q // 128) * 128
        num_qt = 1
    else:
        t_q = 512
        num_qt = -(-Q // t_q)
    q_pad = num_qt * t_q
    tile_in = t_q + max_off

    # --- JAX glue: pad once, flatten once (no 9x shifted-copy materialization) ---
    x_pad = jnp.pad(x_nchw, ((0, 0), (0, 0), (ph, ph), (pw, pw)))      # (N,Cin,Hp,Wp)
    x_flat = x_pad.reshape(N, Cin, Hp * Wp)
    x_flat = jnp.pad(x_flat, ((0, 0), (0, 0), (0, q_pad + max_off - Hp * Wp)))
    if num_qt == 1:
        x_tiles = x_flat[:, None]                                       # (N,1,Cin,tile_in)
    else:
        x_tiles = jnp.stack(
            [x_flat[:, :, qt * t_q: qt * t_q + tile_in] for qt in range(num_qt)],
            axis=1)                                                     # (N,num_qt,Cin,tile_in)
    x_tiles = x_tiles.astype(jnp.bfloat16)

    # Fold taps into the contraction dim of the weights: (Cout, KH*KW*Cin),
    # tap-major / Cin-minor to match the in-kernel patch concatenation order.
    w2 = jnp.transpose(w_hwio.reshape(KH * KW, Cin, Cout), (2, 0, 1))
    w2 = w2.reshape(Cout, KH * KW * Cin).astype(jnp.bfloat16)

    # Validity mask for BN statistics (drops padded-width + tail garbage columns).
    q_idx = jnp.arange(q_pad, dtype=jnp.int32)
    mask = (((q_idx % Wp) < W) & (q_idx < Q)).astype(jnp.float32)
    mask = mask.reshape(num_qt, 1, t_q)

    tap_offsets = tuple(kh * Wp + kw for kh in range(KH) for kw in range(KW))

    # ---------- pass 1: conv (single matmul / tile) + per-channel sum & sumsq ----------
    conv, csum, cssq = pl.pallas_call(
        functools.partial(_conv_stats_kernel, tap_offsets=tap_offsets, t_q=t_q),
        grid=(N, num_qt),
        in_specs=[
            pl.BlockSpec((1, 1, Cin, tile_in), lambda n, qt: (n, qt, 0, 0)),
            pl.BlockSpec((Cout, KH * KW * Cin), lambda n, qt: (0, 0)),
            pl.BlockSpec((1, 1, t_q), lambda n, qt: (qt, 0, 0)),
        ],
        out_specs=[
            pl.BlockSpec((1, Cout, t_q), lambda n, qt: (n, 0, qt)),
            pl.BlockSpec((Cout, 1), lambda n, qt: (0, 0)),
            pl.BlockSpec((Cout, 1), lambda n, qt: (0, 0)),
        ],
        out_shape=[
            jax.ShapeDtypeStruct((N, Cout, q_pad), jnp.bfloat16),
            jax.ShapeDtypeStruct((Cout, 1), jnp.float32),
            jax.ShapeDtypeStruct((Cout, 1), jnp.float32),
        ],
        compiler_params=pltpu.CompilerParams(
            # Stats accumulate across BOTH grid axes -> must stay sequential.
            dimension_semantics=("arbitrary", "arbitrary"),
            vmem_limit_bytes=32 * 1024 * 1024),
    )(x_tiles, w2, mask)

    # ---------- pass 2: fold BN affine in-kernel + normalize (one FMA) + LeakyReLU ----------
    inv_count = 1.0 / float(N * H * W)
    y = pl.pallas_call(
        functools.partial(_bn_lrelu_kernel, inv_count=inv_count, eps=float(eps),
                          neg_slope=neg_slope),
        grid=(N, num_qt),
        in_specs=[
            pl.BlockSpec((1, Cout, t_q), lambda n, qt: (n, 0, qt)),
            pl.BlockSpec((Cout, 1), lambda n, qt: (0, 0)),
            pl.BlockSpec((Cout, 1), lambda n, qt: (0, 0)),
            pl.BlockSpec((Cout, 1), lambda n, qt: (0, 0)),
            pl.BlockSpec((Cout, 1), lambda n, qt: (0, 0)),
        ],
        out_specs=pl.BlockSpec((1, Cout, t_q), lambda n, qt: (n, 0, qt)),
        out_shape=jax.ShapeDtypeStruct((N, Cout, q_pad), jnp.float32),
        compiler_params=pltpu.CompilerParams(
            dimension_semantics=("parallel", "parallel"),
            vmem_limit_bytes=32 * 1024 * 1024),
    )(conv, csum, cssq,
      gamma.astype(jnp.float32).reshape(Cout, 1),
      beta.astype(jnp.float32).reshape(Cout, 1))

    # Already in (N, Cout, spatial) order: just drop the padded-width columns. No transpose.
    return y[:, :, :Q].reshape(N, Cout, H, Wp)[:, :, :, :W]


def _reference(x_nchw, w_hwio, bias, gamma, beta, eps=1e-5, neg_slope=0.01):
    x = jnp.transpose(x_nchw, (0, 2, 3, 1))
    conv = jax.lax.conv_general_dilated(
        x, w_hwio, window_strides=(1, 1), padding="SAME",
        dimension_numbers=("NHWC", "HWIO", "NHWC"))
    conv = conv + bias.reshape(1, 1, 1, -1)
    mean = conv.mean(axis=(0, 1, 2))
    var = ((conv - mean) ** 2).mean(axis=(0, 1, 2))
    y = (conv - mean) * jax.lax.rsqrt(var + eps) * gamma + beta
    y = jnp.where(y > 0, y, neg_slope * y)
    return jnp.transpose(y, (0, 3, 1, 2))


if __name__ == "__main__":
    # SimpleConv(in_c=4, out_c=8, kernel_size=3)
    N, Cin, H, W = 2, 4, 16, 16
    Cout, K = 8, 3

    key = jax.random.PRNGKey(0)
    k1, k2, k3, k4, k5 = jax.random.split(key, 5)
    w = 0.1 * jax.random.normal(k1, (K, K, Cin, Cout), jnp.float32)   # HWIO
    b = 0.1 * jax.random.normal(k2, (Cout,), jnp.float32)
    gamma = 1.0 + 0.1 * jax.random.normal(k3, (Cout,), jnp.float32)
    beta = 0.1 * jax.random.normal(k4, (Cout,), jnp.float32)
    x = jax.random.normal(k5, (N, Cin, H, W), jnp.float32)            # NCHW input

    fwd = jax.jit(simple_conv_forward)
    out = jax.block_until_ready(fwd(x, w, b, gamma, beta))
    ref = jax.block_until_ready(_reference(x, w, b, gamma, beta))

    assert out.shape == (N, Cout, H, W), out.shape
    err = float(jnp.max(jnp.abs(out - ref)))
    # bf16 matmul inputs + bf16 conv intermediate -> relaxed tolerance.
    assert jnp.allclose(out, ref, atol=3e-2, rtol=3e-2), err
    print("KERNEL_OK")
</pallas_src>

<mosaic_0001>
module attributes {stable_mosaic.version = 11 : i64} {
  func.func @_bn_lrelu_kernel(%arg0: i32, %arg1: i32, %arg2: memref<1x8x384xbf16, #tpu.memory_space<vmem>>, %arg3: memref<8x1xf32, #tpu.memory_space<vmem>>, %arg4: memref<8x1xf32, #tpu.memory_space<vmem>>, %arg5: memref<8x1xf32, #tpu.memory_space<vmem>>, %arg6: memref<8x1xf32, #tpu.memory_space<vmem>>, %arg7: memref<1x8x384xf32, #tpu.memory_space<vmem>>) attributes {dimension_semantics = [#tpu.dimension_semantics<parallel>, #tpu.dimension_semantics<parallel>], iteration_bounds = array<i64: 2, 1>, scalar_prefetch = 0 : i64, scratch_operands = 0 : i64, tpu.core_type = #tpu.core_type<tc>, window_params = [{transform_indices = @transform_0, window_bounds = array<i64: 1, 8, 384>}, {pipeline_mode = #tpu.pipeline_mode<synchronous>, transform_indices = @transform_1, window_bounds = array<i64: 8, 1>}, {pipeline_mode = #tpu.pipeline_mode<synchronous>, transform_indices = @transform_2, window_bounds = array<i64: 8, 1>}, {pipeline_mode = #tpu.pipeline_mode<synchronous>, transform_indices = @transform_3, window_bounds = array<i64: 8, 1>}, {pipeline_mode = #tpu.pipeline_mode<synchronous>, transform_indices = @transform_4, window_bounds = array<i64: 8, 1>}, {transform_indices = @transform_5, window_bounds = array<i64: 1, 8, 384>}]} {
    %c0 = arith.constant 0 : index
    %c0_0 = arith.constant 0 : index
    %0 = vector.load %arg3[%c0, %c0_0] : memref<8x1xf32, #tpu.memory_space<vmem>>, vector<8x1xf32>
    %cst = arith.constant 0.001953125 : f32
    %1 = vector.broadcast %cst : f32 to vector<8x1xf32>
    %2 = arith.mulf %0, %1 : vector<8x1xf32>
    %c0_1 = arith.constant 0 : index
    %c0_2 = arith.constant 0 : index
    %3 = vector.load %arg4[%c0_1, %c0_2] : memref<8x1xf32, #tpu.memory_space<vmem>>, vector<8x1xf32>
    %cst_3 = arith.constant 0.001953125 : f32
    %4 = vector.broadcast %cst_3 : f32 to vector<8x1xf32>
    %5 = arith.mulf %3, %4 : vector<8x1xf32>
    %6 = arith.mulf %2, %2 : vector<8x1xf32>
    %7 = arith.subf %5, %6 : vector<8x1xf32>
    %cst_4 = arith.constant 0.000000e+00 : f32
    %8 = vector.broadcast %cst_4 : f32 to vector<8x1xf32>
    %9 = arith.maximumf %7, %8 : vector<8x1xf32>
    %c0_5 = arith.constant 0 : index
    %c0_6 = arith.constant 0 : index
    %10 = vector.load %arg5[%c0_5, %c0_6] : memref<8x1xf32, #tpu.memory_space<vmem>>, vector<8x1xf32>
    %cst_7 = arith.constant 9.99999974E-6 : f32
    %11 = vector.broadcast %cst_7 : f32 to vector<8x1xf32>
    %12 = arith.addf %9, %11 : vector<8x1xf32>
    %13 = math.rsqrt %12 : vector<8x1xf32>
    %14 = arith.mulf %10, %13 : vector<8x1xf32>
    %c0_8 = arith.constant 0 : index
    %c0_9 = arith.constant 0 : index
    %15 = vector.load %arg6[%c0_8, %c0_9] : memref<8x1xf32, #tpu.memory_space<vmem>>, vector<8x1xf32>
    %16 = arith.mulf %2, %14 : vector<8x1xf32>
    %17 = arith.subf %15, %16 : vector<8x1xf32>
    %c0_10 = arith.constant 0 : index
    %c0_11 = arith.constant 0 : index
    %c0_12 = arith.constant 0 : index
    %18 = vector.load %arg2[%c0_10, %c0_11, %c0_12] : memref<1x8x384xbf16, #tpu.memory_space<vmem>>, vector<1x8x384xbf16>
    %19 = arith.extf %18 : vector<1x8x384xbf16> to vector<1x8x384xf32>
    %20 = vector.shape_cast %14 : vector<8x1xf32> to vector<1x8x1xf32>
    %21 = vector.broadcast %20 : vector<1x8x1xf32> to vector<1x8x384xf32>
    %22 = arith.mulf %19, %21 : vector<1x8x384xf32>
    %23 = vector.shape_cast %17 : vector<8x1xf32> to vector<1x8x1xf32>
    %24 = vector.broadcast %23 : vector<1x8x1xf32> to vector<1x8x384xf32>
    %25 = arith.addf %22, %24 : vector<1x8x384xf32>
    %cst_13 = arith.constant 0.000000e+00 : f32
    %26 = vector.broadcast %cst_13 : f32 to vector<1x8x384xf32>
    %27 = arith.cmpf ogt, %25, %26 : vector<1x8x384xf32>
    %cst_14 = arith.constant 0.00999999977 : f32
    %28 = vector.broadcast %cst_14 : f32 to vector<1x8x384xf32>
    %29 = arith.mulf %28, %25 : vector<1x8x384xf32>
    %30 = arith.select %27, %25, %29 : vector<1x8x384xi1>, vector<1x8x384xf32>
    %c0_15 = arith.constant 0 : index
    %c0_16 = arith.constant 0 : index
    %c0_17 = arith.constant 0 : index
    %31 = vector.load %arg7[%c0_15, %c0_16, %c0_17] : memref<1x8x384xf32, #tpu.memory_space<vmem>>, vector<1x8x384xf32>
    tpu.vector_store %arg7[%c0_15, %c0_16, %c0_17], %30 {strides = array<i32>} : memref<1x8x384xf32, #tpu.memory_space<vmem>>, vector<1x8x384xf32>,
    return
  }
  func.func @transform_0(%arg0: i32, %arg1: i32) -> (i32, i32, i32) {
    %c0_i32 = arith.constant 0 : i32
    %c0_i32_0 = arith.constant 0 : i32
    return %arg0, %c0_i32, %arg1 : i32, i32, i32
  }
  func.func @transform_1(%arg0: i32, %arg1: i32) -> (i32, i32) {
    %c0_i32 = arith.constant 0 : i32
    %c0_i32_0 = arith.constant 0 : i32
    %c0_i32_1 = arith.constant 0 : i32
    return %c0_i32, %c0_i32_0 : i32, i32
  }
  func.func @transform_2(%arg0: i32, %arg1: i32) -> (i32, i32) {
    %c0_i32 = arith.constant 0 : i32
    %c0_i32_0 = arith.constant 0 : i32
    %c0_i32_1 = arith.constant 0 : i32
    return %c0_i32, %c0_i32_0 : i32, i32
  }
  func.func @transform_3(%arg0: i32, %arg1: i32) -> (i32, i32) {
    %c0_i32 = arith.constant 0 : i32
    %c0_i32_0 = arith.constant 0 : i32
    %c0_i32_1 = arith.constant 0 : i32
    return %c0_i32, %c0_i32_0 : i32, i32
  }
  func.func @transform_4(%arg0: i32, %arg1: i32) -> (i32, i32) {
    %c0_i32 = arith.constant 0 : i32
    %c0_i32_0 = arith.constant 0 : i32
    %c0_i32_1 = arith.constant 0 : i32
    return %c0_i32, %c0_i32_0 : i32, i32
  }
  func.func @transform_5(%arg0: i32, %arg1: i32) -> (i32, i32, i32) {
    %c0_i32 = arith.constant 0 : i32
    %c0_i32_0 = arith.constant 0 : i32
    return %arg0, %c0_i32, %arg1 : i32, i32, i32
  }
}

module attributes {stable_mosaic.version = 11 : i64} {
  func.func @_conv_stats_kernel(%arg0: i32, %arg1: i32, %arg2: memref<1x1x4x422xbf16, #tpu.memory_space<vmem>>, %arg3: memref<8x36xbf16, #tpu.memory_space<vmem>>, %arg4: memref<1x1x384xf32, #tpu.memory_space<vmem>>, %arg5: memref<1x8x384xbf16, #tpu.memory_space<vmem>>, %arg6: memref<8x1xf32, #tpu.memory_space<vmem>>, %arg7: memref<8x1xf32, #tpu.memory_space<vmem>>) attributes {dimension_semantics = [#tpu.dimension_semantics<arbitrary>, #tpu.dimension_semantics<arbitrary>], iteration_bounds = array<i64: 2, 1>, scalar_prefetch = 0 : i64, scratch_operands = 0 : i64, tpu.core_type = #tpu.core_type<tc>, window_params = [{transform_indices = @transform_0, window_bounds = array<i64: 1, 1, 4, 422>}, {pipeline_mode = #tpu.pipeline_mode<synchronous>, transform_indices = @transform_1, window_bounds = array<i64: 8, 36>}, {transform_indices = @transform_2, window_bounds = array<i64: 1, 1, 384>}, {transform_indices = @transform_3, window_bounds = array<i64: 1, 8, 384>}, {pipeline_mode = #tpu.pipeline_mode<synchronous>, transform_indices = @transform_4, window_bounds = array<i64: 8, 1>}, {pipeline_mode = #tpu.pipeline_mode<synchronous>, transform_indices = @transform_5, window_bounds = array<i64: 8, 1>}]} {
    %c0_i32 = arith.constant 0 : i32
    %0 = arith.cmpi eq, %arg0, %c0_i32 : i32
    %c0_i32_0 = arith.constant 0 : i32
    %1 = arith.cmpi eq, %arg1, %c0_i32_0 : i32
    %2 = arith.andi %0, %1 : i1
    %3 = arith.extui %2 : i1 to i32
    %c0_i32_1 = arith.constant 0 : i32
    %4 = arith.cmpi ne, %3, %c0_i32_1 : i32
    scf.if %4 {
      %cst_23 = arith.constant 0.000000e+00 : f32
      %38 = vector.broadcast %cst_23 : f32 to vector<8x1xf32>
      %c0_24 = arith.constant 0 : index
      %c0_25 = arith.constant 0 : index
      %39 = vector.load %arg6[%c0_24, %c0_25] : memref<8x1xf32, #tpu.memory_space<vmem>>, vector<8x1xf32>
      tpu.vector_store %arg6[%c0_24, %c0_25], %38 {strides = array<i32>} : memref<8x1xf32, #tpu.memory_space<vmem>>, vector<8x1xf32>,
      %cst_26 = arith.constant 0.000000e+00 : f32
      %40 = vector.broadcast %cst_26 : f32 to vector<8x1xf32>
      %c0_27 = arith.constant 0 : index
      %c0_28 = arith.constant 0 : index
      %41 = vector.load %arg7[%c0_27, %c0_28] : memref<8x1xf32, #tpu.memory_space<vmem>>, vector<8x1xf32>
      tpu.vector_store %arg7[%c0_27, %c0_28], %40 {strides = array<i32>} : memref<8x1xf32, #tpu.memory_space<vmem>>, vector<8x1xf32>,
    } else {
    }
    %c0 = arith.constant 0 : index
    %c0_2 = arith.constant 0 : index
    %c0_3 = arith.constant 0 : index
    %c0_4 = arith.constant 0 : index
    %5 = vector.load %arg2[%c0, %c0_2, %c0_3, %c0_4] : memref<1x1x4x422xbf16, #tpu.memory_space<vmem>>, vector<1x1x4x422xbf16>
    %6 = vector.shape_cast %5 : vector<1x1x4x422xbf16> to vector<4x422xbf16>
    %7 = vector.extract_strided_slice %6 {offsets = [0, 0], sizes = [4, 384], strides = [1, 1]} : vector<4x422xbf16> to vector<4x384xbf16>
    %8 = vector.extract_strided_slice %6 {offsets = [0, 1], sizes = [4, 384], strides = [1, 1]} : vector<4x422xbf16> to vector<4x384xbf16>
    %9 = vector.extract_strided_slice %6 {offsets = [0, 2], sizes = [4, 384], strides = [1, 1]} : vector<4x422xbf16> to vector<4x384xbf16>
    %10 = vector.extract_strided_slice %6 {offsets = [0, 18], sizes = [4, 384], strides = [1, 1]} : vector<4x422xbf16> to vector<4x384xbf16>
    %11 = vector.extract_strided_slice %6 {offsets = [0, 19], sizes = [4, 384], strides = [1, 1]} : vector<4x422xbf16> to vector<4x384xbf16>
    %12 = vector.extract_strided_slice %6 {offsets = [0, 20], sizes = [4, 384], strides = [1, 1]} : vector<4x422xbf16> to vector<4x384xbf16>
    %13 = vector.extract_strided_slice %6 {offsets = [0, 36], sizes = [4, 384], strides = [1, 1]} : vector<4x422xbf16> to vector<4x384xbf16>
    %14 = vector.extract_strided_slice %6 {offsets = [0, 37], sizes = [4, 384], strides = [1, 1]} : vector<4x422xbf16> to vector<4x384xbf16>
    %15 = vector.extract_strided_slice %6 {offsets = [0, 38], sizes = [4, 384], strides = [1, 1]} : vector<4x422xbf16> to vector<4x384xbf16>
    %16 = tpu.concatenate %7, %8, %9, %10, %11, %12, %13, %14, %15 in 0 : vector<4x384xbf16>, vector<4x384xbf16>, vector<4x384xbf16>, vector<4x384xbf16>, vector<4x384xbf16>, vector<4x384xbf16>, vector<4x384xbf16>, vector<4x384xbf16>, vector<4x384xbf16> -> vector<36x384xbf16>
    %c0_5 = arith.constant 0 : index
    %c0_6 = arith.constant 0 : index
    %17 = vector.load %arg3[%c0_5, %c0_6] : memref<8x36xbf16, #tpu.memory_space<vmem>>, vector<8x36xbf16>
    %cst = arith.constant dense<0.000000e+00> : vector<8x384xf32>
    %18 = tpu.matmul %17, %16, %cst {dimension_numbers = #tpu.dot_dimension_numbers<[1], [0], [0], [1], [0, 0, 1, 1], [], []>} : vector<8x36xbf16>, vector<36x384xbf16>, vector<8x384xf32> -> vector<8x384xf32>
    %19 = arith.truncf %18 : vector<8x384xf32> to vector<8x384xbf16>
    %c0_7 = arith.constant 0 : index
    %c0_8 = arith.constant 0 : index
    %c0_9 = arith.constant 0 : index
    %20 = vector.load %arg5[%c0_7, %c0_8, %c0_9] : memref<1x8x384xbf16, #tpu.memory_space<vmem>>, vector<1x8x384xbf16>
    %21 = vector.shape_cast %20 : vector<1x8x384xbf16> to vector<8x384xbf16>
    %22 = vector.shape_cast %19 : vector<8x384xbf16> to vector<1x8x384xbf16>
    tpu.vector_store %arg5[%c0_7, %c0_8, %c0_9], %22 {strides = array<i32>} : memref<1x8x384xbf16, #tpu.memory_space<vmem>>, vector<1x8x384xbf16>,
    %c0_10 = arith.constant 0 : index
    %c0_11 = arith.constant 0 : index
    %c0_12 = arith.constant 0 : index
    %23 = vector.load %arg4[%c0_10, %c0_11, %c0_12] : memref<1x1x384xf32, #tpu.memory_space<vmem>>, vector<1x1x384xf32>
    %24 = vector.shape_cast %23 : vector<1x1x384xf32> to vector<1x384xf32>
    %25 = vector.broadcast %24 : vector<1x384xf32> to vector<8x384xf32>
    %26 = arith.mulf %18, %25 : vector<8x384xf32>
    %c0_13 = arith.constant 0 : index
    %c0_14 = arith.constant 0 : index
    %27 = vector.load %arg6[%c0_13, %c0_14] : memref<8x1xf32, #tpu.memory_space<vmem>>, vector<8x1xf32>
    %cst_15 = arith.constant dense<0.000000e+00> : vector<8xf32>
    %28 = vector.multi_reduction <add>, %26, %cst_15 [1] : vector<8x384xf32> to vector<8xf32>
    %29 = vector.shape_cast %28 : vector<8xf32> to vector<8x1xf32>
    %30 = arith.addf %27, %29 : vector<8x1xf32>
    %c0_16 = arith.constant 0 : index
    %c0_17 = arith.constant 0 : index
    %31 = vector.load %arg6[%c0_16, %c0_17] : memref<8x1xf32, #tpu.memory_space<vmem>>, vector<8x1xf32>
    tpu.vector_store %arg6[%c0_16, %c0_17], %30 {strides = array<i32>} : memref<8x1xf32, #tpu.memory_space<vmem>>, vector<8x1xf32>,
    %c0_18 = arith.constant 0 : index
    %c0_19 = arith.constant 0 : index
    %32 = vector.load %arg7[%c0_18, %c0_19] : memref<8x1xf32, #tpu.memory_space<vmem>>, vector<8x1xf32>
    %33 = arith.mulf %26, %18 : vector<8x384xf32>
    %cst_20 = arith.constant dense<0.000000e+00> : vector<8xf32>
    %34 = vector.multi_reduction <add>, %33, %cst_20 [1] : vector<8x384xf32> to vector<8xf32>
    %35 = vector.shape_cast %34 : vector<8xf32> to vector<8x1xf32>
    %36 = arith.addf %32, %35 : vector<8x1xf32>
    %c0_21 = arith.constant 0 : index
    %c0_22 = arith.constant 0 : index
    %37 = vector.load %arg7[%c0_21, %c0_22] : memref<8x1xf32, #tpu.memory_space<vmem>>, vector<8x1xf32>
    tpu.vector_store %arg7[%c0_21, %c0_22], %36 {strides = array<i32>} : memref<8x1xf32, #tpu.memory_space<vmem>>, vector<8x1xf32>,
    return
  }
  func.func @transform_0(%arg0: i32, %arg1: i32) -> (i32, i32, i32, i32) {
    %c0_i32 = arith.constant 0 : i32
    %c0_i32_0 = arith.constant 0 : i32
    %c0_i32_1 = arith.constant 0 : i32
    return %arg0, %arg1, %c0_i32, %c0_i32_0 : i32, i32, i32, i32
  }
  func.func @transform_1(%arg0: i32, %arg1: i32) -> (i32, i32) {
    %c0_i32 = arith.constant 0 : i32
    %c0_i32_0 = arith.constant 0 : i32
    %c0_i32_1 = arith.constant 0 : i32
    return %c0_i32, %c0_i32_0 : i32, i32
  }
  func.func @transform_2(%arg0: i32, %arg1: i32) -> (i32, i32, i32) {
    %c0_i32 = arith.constant 0 : i32
    %c0_i32_0 = arith.constant 0 : i32
    %c0_i32_1 = arith.constant 0 : i32
    return %arg1, %c0_i32, %c0_i32_0 : i32, i32, i32
  }
  func.func @transform_3(%arg0: i32, %arg1: i32) -> (i32, i32, i32) {
    %c0_i32 = arith.constant 0 : i32
    %c0_i32_0 = arith.constant 0 : i32
    return %arg0, %c0_i32, %arg1 : i32, i32, i32
  }
  func.func @transform_4(%arg0: i32, %arg1: i32) -> (i32, i32) {
    %c0_i32 = arith.constant 0 : i32
    %c0_i32_0 = arith.constant 0 : i32
    %c0_i32_1 = arith.constant 0 : i32
    return %c0_i32, %c0_i32_0 : i32, i32
  }
  func.func @transform_5(%arg0: i32, %arg1: i32) -> (i32, i32) {
    %c0_i32 = arith.constant 0 : i32
    %c0_i32_0 = arith.constant 0 : i32
    %c0_i32_1 = arith.constant 0 : i32
    return %c0_i32, %c0_i32_0 : i32, i32
  }
}

</mosaic_0001>

<bundles_post_ra>
// kernel: simple_conv_forward.3
= control target key start
LH: loop header
LB: loop body
LE: loop exit
PB: predicated region body
PF: predicated region fallthrough
CT: control target
= control target key end

     0   :  { %s492_s18 = smov 0   ;;  %s494_s19 = smov 0   ;;  %s541_s0 = inlined_call_operand.vmem [shape: bf16[2,8,384], index: 0, kind: input, shape index: {}]   ;;  %s542_s1 = inlined_call_operand.vmem [shape: f32[8,1], index: 1, kind: input, shape index: {}]   ;;  %s543_s2 = inlined_call_operand.vmem [shape: f32[8,1], index: 2, kind: input, shape index: {}]   ;;  %s544_s3 = inlined_call_operand.vmem [shape: f32[8,1], index: 3, kind: input, shape index: {}]   ;;  %s545_s4 = inlined_call_operand.vmem [shape: f32[8,1], index: 4, kind: input, shape index: {}]   ;;  %s546_s5 = inlined_call_operand.vmem [shape: f32[2,8,384], index: 5, kind: output, shape index: {}]  }
   0x1   :  { %s496_s20 = smov 0  }
   0x2 LB: > { %s27_s21 = sadd.s32 1, %s455_s19  ;;  %p402_p0 = scmp.ge.s32.totalorder %s459_s20, 1  ;;  %s459_s20 = sphi %s496_s20, %s15_s20   ;;  %s455_s19 = sphi %s494_s19, %s548_s19   ;;  %s451_s18 = sphi %s492_s18, %s547_s18  }
   0x3   : > { %p29_p1 = scmp.ge.s32.totalorder %s27_s21, 2  ;;  %p208_p2 = scmp.lt.s32.totalorder %s459_s20, 3 }
   0x5   : > { %s550_s21 = smov (%p29_p1, %s27_s21), 0  ;;  %p209_p3 = pnand %p402_p0, %p208_p2 }
   0x6   : > { %p245_p4 = scmp.lt.s32.totalorder (!%p209_p3), %s451_s18, 1 }
   0x7   : > { %212 = sbr.rel (%p209_p3) target bundleno = 174 (0xae), region = 40 }
   0xc   : > { %v264_v0 = vld [vmem:[%s542_s1] sm:$0xff]  ;;  %v461_v2 = vmov 0   ;;  %s552_s18 = smov (!%p245_p4, %s451_s18), 1 }
   0xd   : > { %v266_v1 = vld [vmem:[%s543_s2] sm:$0xff]  ;;  %434 = vset.pattern.permute.xlu0 %v461_v2  ;;  %v265_v3 = vmul.f32 0.001953125, %v264_v0  ;;  %s407_s30 = smul.u32 12, %s552_s18 }
   0xe   : > { %v267_v4 = vmul.f32 0.001953125, %v266_v1  ;;  %v271_v9 = vld [vmem:[%s544_s3] sm:$0xff]  ;;  %s408_s9 = smul.u32 24, %s552_s18 }
   0xf   : > { %v268_v5 = vmul.f32 %v265_v3, %v265_v3  ;;  %v275_v12 = vld [vmem:[%s545_s4] sm:$0xff]  ;;  %s252_s8 = scalar_lea.vmem %s541_s0, %s407_s30 }
  0x10   : > { %v278_v15 = vld [vmem:[%s252_s8] sm:$0xff]  ;;  %v279_v16 = vld [vmem:[%s252_s8 + $0x8] sm:$0xf]  ;;  %s262_s12 = scalar_lea.vmem %s546_s5, %s408_s9 }
  0x11   : > { %v269_v6 = vsub.f32 %v267_v4, %v268_v5  ;;  %v280_v17 = vunpack.c.l.bf16 %v278_v15  ;;  %v281_v18 = vunpack.c.h.bf16 %v278_v15  ;;  %v282_v19 = vunpack.c.l.bf16 %v279_v16 }
  0x13   : > { %v270_v7 = vmax.f32 %v269_v6, 0.0 }
  0x15   : > { %v272_v8 = vadd.f32 1e-05, %v270_v7 }
  0x17   : > { %435 = vrsqrt.f32 %v272_v8 }
  0x24   : > { %v436_v10 = vpop.eup %435 }
  0x25   : > { %v274_v11 = vmul.f32 %v436_v10, %v271_v9 }
  0x27   : > { %285 = vperm.xlu0 %434, %v274_v11   ;;  %v276_v13 = vmul.f32 %v274_v11, %v265_v3 }
  0x29   : > { %v277_v14 = vsub.f32 %v275_v12, %v276_v13 }
  0x2b   : > { %293 = vperm.xlu0 %434, %v277_v14  }
  0xa2   : > { %v286_v20 = vpop.permute.xlu0 %285 }
  0xa3   : > { %v288_v21 = vmul.f32 %v286_v20, %v280_v17  ;;  %v289_v22 = vmul.f32 %v286_v20, %v281_v18  ;;  %v290_v23 = vmul.f32 %v286_v20, %v282_v19 }
  0xa6   : > { %v294_v24 = vpop.permute.xlu0 %293 }
  0xa7   : > { %v296_v25 = vadd.f32 %v294_v24, %v288_v21  ;;  %v297_v26 = vadd.f32 %v294_v24, %v289_v22  ;;  %v298_v27 = vadd.f32 %v294_v24, %v290_v23 }
  0xa9   : > { %vm299_vm0 = vcmp.gt.f32.partialorder %v296_v25, 0.0  ;;  %vm300_vm1 = vcmp.gt.f32.partialorder %v297_v26, 0.0  ;;  %vm301_vm2 = vcmp.gt.f32.partialorder %v298_v27, 0.0  ;;  %v302_v28 = vmul.f32 0.01, %v296_v25 }
  0xaa   : > { %v303_v29 = vmul.f32 0.01, %v297_v26  ;;  %v304_v30 = vmul.f32 0.01, %v298_v27 }
  0xab   : > { %v305_v31 = vsel %vm299_vm0, %v296_v25, %v302_v28 }
  0xac   : > { %v306_v32 = vsel %vm300_vm1, %v297_v26, %v303_v29  ;;  %v307_v33 = vsel %vm301_vm2, %v298_v27, %v304_v30  ;;  %308 = vst [vmem:[%s262_s12] sm:$0xff] %v305_v31 }
  0xad   : > { %309 = vst [vmem:[%s262_s12 + $0x8] sm:$0xff] %v306_v32  ;;  %310 = vst [vmem:[%s262_s12 + $0x10] sm:$0xff] %v307_v33 }
  0xae PF: > { %s15_s20 = sadd.s32 1, %s459_s20   ;;  %s547_s18 = smov %s455_s19 }
  0xaf   : > { %p12_p5 = scmp.ge.s32.totalorder %s15_s20, 4   ;;  %s548_s19 = smov %s550_s21 }
  0xb1   :  { %14 = sbr.rel (!%p12_p5) target bundleno = 2 (0x2), region = 70 }

// kernel: simple_conv_forward.2
= control target key start
LH: loop header
LB: loop body
LE: loop exit
PB: predicated region body
PF: predicated region fallthrough
CT: control target
= control target key end

     0   :  { %s869_s18 = smov 0   ;;  %s871_s19 = smov 0   ;;  %s1036_s0 = inlined_call_operand.vmem [shape: bf16[2,1,4,422], index: 0, kind: input, shape index: {}]   ;;  %s1037_s1 = inlined_call_operand.vmem [shape: bf16[8,36], index: 1, kind: input, shape index: {}]   ;;  %s1038_s2 = inlined_call_operand.vmem [shape: f32[1,1,384], index: 2, kind: input, shape index: {}]   ;;  %s1039_s3 = inlined_call_operand.vmem [shape: bf16[2,8,384], index: 3, kind: output, shape index: {0}]   ;;  %s1040_s4 = inlined_call_operand.vmem [shape: f32[8,1], index: 4, kind: output, shape index: {1}]   ;;  %s1041_s5 = inlined_call_operand.vmem [shape: f32[8,1], index: 5, kind: output, shape index: {2}]  }
   0x1   :  { %s873_s20 = smov 0  }
   0x2 LB: > { %s28_s21 = sadd.s32 1, %s820_s19  ;;  %p732_p0 = scmp.ge.s32.totalorder %s824_s20, 1  ;;  %s824_s20 = sphi %s873_s20, %s16_s20   ;;  %s820_s19 = sphi %s871_s19, %s1043_s19   ;;  %s816_s18 = sphi %s869_s18, %s1042_s18  }
   0x3   : > { %p30_p1 = scmp.ge.s32.totalorder %s28_s21, 2  ;;  %p211_p2 = scmp.lt.s32.totalorder %s824_s20, 3 }
   0x5   : > { %s1045_s21 = smov (%p30_p1, %s28_s21), 0  ;;  %p212_p3 = pnand %p732_p0, %p211_p2 }
   0x6   : > { %p251_p4 = scmp.lt.s32.totalorder (!%p212_p3), %s816_s18, 1  ;;  %p275_p5 = scmp.eq.s32.totalorder (!%p212_p3), %s816_s18, 0 }
   0x7   : > { %215 = sbr.rel (%p212_p3) target bundleno = 547 (0x223), region = 32 }
   0xc   : > { %s1047_s18 = smov (!%p251_p4, %s816_s18), 1  ;;  %280 = sbr.rel (!%p275_p5) target bundleno = 17 (0x11), region = 36  ;;  %vm281_vm0 = vcmask (%p275_p5), 7168   ;;  %v826_v0 = vmov (%p275_p5), 0.0  }
   0xd   : > { %s744_s22 = sshll.u32 %s1047_s18, 3  ;;  %s762_s23 = smul.u32 12, %s1047_s18  ;;  %282 = vst.msk [vmem:[%s1040_s4] sm:$0xff] (%p275_p5), %vm281_vm0, %v826_v0  ;;  %283 = vst.msk [vmem:[%s1041_s5] sm:$0xff] (%p275_p5), %vm281_vm0, %v826_v0 }
   0xe   : > { %s259_s26 = scalar_lea.vmem %s1036_s0, %s744_s22 }
   0xf   : > { %s893_s29 = scalar_lea.vmem %s1039_s3, %s762_s23 }
  0x11 PF: > { %v284_v1 = vld [vmem:[%s259_s26] sm:$0xff]  ;;  %v290_v2 = vlaneseq  ;;  %v827_v3 = vmov 1983009808   ;;  %s828_s9 = smov 90   ;;  %s829_s10 = smov 109   ;;  %v832_v17 = vmov 0.0  }
  0x12   : > { %v288_v4 = vunpack.c.l.s4 %v827_v3  ;;  %v286_v7 = vcombine.high %v284_v1, %v284_v1  ;;  %v302_v9 = vcombine.low %v284_v1, %v284_v1  ;;  %s830_s11 = smov 108   ;;  %s831_s12 = smov 92   ;;  %752 = vmatprep.subr.bf16.mxu1 %v832_v17  ;;  %v836_v20 = vmov 0  }
  0x13   : > { %v901_v5 = vshrl.u32 %v290_v2, 7  ;;  %s833_s13 = smov 91   ;;  %s834_s14 = smov 127   ;;  %508 = vmatprep.mubr.bf16.mxu0 %v836_v20  ;;  %vm838_vm1 = vmmov 0   ;;  %vm407_vm2 = vcmask 736256   ;;  %vm411_vm3 = vcmask 1041408  }
  0x14   : > { %v289_v6 = vunpack.c.0.s8 %v288_v4  ;;  %s835_s15 = smov 126   ;;  %s837_s16 = smov 110   ;;  %758 = vmatprep.mubr.msk.bf16.mxu1 %vm838_vm1, %v832_v17  ;;  %vm371_vm4 = vcmask 883712   ;;  %vm383_vm5 = vcmask 752640   ;;  %vm359_vm6 = vcmask 891904  }
  0x15   : > { %vm395_vm7 = vcmask 744448   ;;  %vm421_vm8 = vcmask 1043456   ;;  %vm428_vm9 = vcmask 1045504   ;;  %vm319_vm10 = vcmask 1039360  }
  0x16   : > { %v292_v8 = vsub.s32 %v289_v6, %v901_v5  ;;  %vm333_vm11 = vcmask 1031168   ;;  %vm346_vm12 = vcmask 900096   ;;  %vm463_vm13 = vcmask 293888  }
  0x17   : > { %vm598_vm14 = vcmask 7168  }
  0x18   : > { %v904_v10 = vrot.slane %v284_v1, %v292_v8  ;;  %v906_v11 = vrot.slane %v286_v7, %v292_v8  ;;  %v309_v13 = vrot.slane %v302_v9, %v292_v8 }
  0x1a   : > { %399 = vrot.lane.b32.xlu0 %v904_v10, %s828_s9  ;;  %403 = vrot.lane.b32.xlu1 %v906_v11, %s828_s9  ;;  %v912_v12 = vcombine.high %v904_v10, %v904_v10  ;;  %v310_v14 = vcombine.high %v309_v13, %v309_v13  ;;  %v323_v15 = vcombine.low %v904_v10, %v904_v10 }
  0x1b   : > { %v324_v16 = vcombine.low %v906_v11, %v906_v11  ;;  %v350_v18 = vcombine.high %v906_v11, %v906_v11  ;;  %v337_v19 = vcombine.low %v309_v13, %v309_v13 }
  0x1e   : > { %355 = vrot.lane.b32.xlu0 %v906_v11, %s829_s10  ;;  %353 = vrot.lane.b32.xlu1 %v912_v12, %s829_s10 }
  0x22   : > { %401 = vrot.lane.b32.xlu0 %v912_v12, %s828_s9  ;;  %365 = vrot.lane.b32.xlu1 %v310_v14, %s830_s11 }
  0x26   : > { %367 = vrot.lane.b32.xlu0 %v904_v10, %s830_s11  ;;  %351 = vrot.lane.b32.xlu1 %v904_v10, %s829_s10 }
  0x2a   : > { %363 = vrot.lane.b32.xlu0 %v309_v13, %s830_s11  ;;  %377 = vrot.lane.b32.xlu1 %v904_v10, %s831_s12 }
  0x2e   : > { %375 = vrot.lane.b32.xlu1 %v323_v15, %s831_s12  ;;  %379 = vrot.lane.b32.xlu0 %v324_v16, %s831_s12 }
  0x32   : > { %391 = vrot.lane.b32.xlu1 %v323_v15, %s833_s13  ;;  %389 = vrot.lane.b32.xlu0 %v309_v13, %s833_s13 }
  0x36   : > { %405 = vrot.lane.b32.xlu1 %v350_v18, %s828_s9  ;;  %387 = vrot.lane.b32.xlu0 %v337_v19, %s833_s13 }
  0x3a   : > { %315 = vrot.lane.b32.xlu1 %v904_v10, %s834_s14  ;;  %313 = vrot.lane.b32.xlu0 %v310_v14, %s834_s14 }
  0x3e   : > { %327 = vrot.lane.b32.xlu1 %v904_v10, %s835_s15  ;;  %311 = vrot.lane.b32.xlu0 %v309_v13, %s834_s14 }
  0x42   : > { %357 = vrot.lane.b32.xlu1 %v350_v18, %s829_s10  ;;  %329 = vrot.lane.b32.xlu0 %v324_v16, %s835_s15 }
  0x46   : > { %325 = vrot.lane.b32.xlu1 %v323_v15, %s835_s15  ;;  %369 = vrot.lane.b32.xlu0 %v912_v12, %s830_s11 }
  0x4a   : > { %342 = vrot.lane.b32.xlu1 %v323_v15, %s837_s16  ;;  %340 = vrot.lane.b32.xlu0 %v309_v13, %s837_s16 }
  0x4e   : > { %338 = vrot.lane.b32.xlu1 %v337_v19, %s837_s16  ;;  %381 = vrot.lane.b32.xlu0 %v906_v11, %s831_s12 }
  0x52   : > { %317 = vrot.lane.b32.xlu1 %v912_v12, %s834_s14  ;;  %393 = vrot.lane.b32.xlu0 %v904_v10, %s833_s13 }
  0x56   : > { %344 = vrot.lane.b32.xlu1 %v904_v10, %s837_s16  ;;  %331 = vrot.lane.b32.xlu0 %v906_v11, %s835_s15 }
  0x8c   : > { %v400_v21 = vpop.permute.xlu0 %399  ;;  %v404_v22 = vpop.permute.xlu1 %403 }
  0x90   : > { %v948_v23 = vpop.permute.xlu0 %355  ;;  %v354_v24 = vpop.permute.xlu1 %353 }
  0x91   : > { %v361_v38 = vsel %vm359_vm6, %v354_v24, %v948_v23 }
  0x94   : > { %v402_v25 = vpop.permute.xlu0 %401  ;;  %v366_v26 = vpop.permute.xlu1 %365 }
  0x95   : > { %v409_v27 = vsel %vm407_vm2, %v402_v25, %v404_v22  ;;  %v408_v28 = vsel %vm407_vm2, %v400_v21, %v402_v25 }
  0x96   : > { %737 = vmatprep.subr.msk.bf16.mxu0 %vm411_vm3, %v409_v27  ;;  %v468_v29 = vsel %vm411_vm3, %v408_v28, 0 }
  0x97   : > { %487 = vmatpush1.bf16.msra.mxu0 %v468_v29 }
  0x98   : > { %v368_v30 = vpop.permute.xlu0 %367  ;;  %v352_v31 = vpop.permute.xlu1 %351 }
  0x99   : > { %v373_v36 = vsel %vm371_vm4, %v366_v26, %v368_v30  ;;  %v360_v47 = vsel %vm359_vm6, %v352_v31, %v354_v24 }
  0x9a   : > { %v443_v39 = vsel %vm411_vm3, %v361_v38, %v373_v36  ;;  %v580_v38 = vsub.s32 1, %v901_v5 }
  0x9c   : > { %v364_v32 = vpop.permute.xlu0 %363  ;;  %v378_v33 = vpop.permute.xlu1 %377 }
  0x9d   : > { %v372_v42 = vsel %vm371_vm4, %v364_v32, %v366_v26 }
  0x9e   : > { %v440_v48 = vsel %vm411_vm3, %v360_v47, %v372_v42  ;;  %v584_v42 = vsub.s32 2, %v901_v5 }
  0xa0   : > { %v376_v34 = vpop.permute.xlu1 %375  ;;  %v380_v35 = vpop.permute.xlu0 %379 }
  0xa1   : > { %v385_v37 = vsel %vm383_vm5, %v378_v33, %v380_v35  ;;  %v384_v45 = vsel %vm383_vm5, %v376_v34, %v378_v33 }
  0xa2   : > { %v450_v44 = vsel %vm421_vm8, %v443_v39, %v385_v37  ;;  %v448_v52 = vsel %vm421_vm8, %v440_v48, %v384_v45  ;;  %v576_v37 = vsub.s32 0, %v901_v5 }
  0xa4   : > { %v392_v40 = vpop.permute.xlu1 %391  ;;  %v390_v41 = vpop.permute.xlu0 %389 }
  0xa5   : > { %v397_v43 = vsel %vm395_vm7, %v390_v41, %v392_v40 }
  0xa6   : > { %v457_v46 = vsel %vm428_vm9, %v450_v44, %v397_v43 }
  0xa7   : > { %488 = vmatprep.subr.bf16.mxu0 %v457_v46 }
  0xa8   : > { %v406_v49 = vpop.permute.xlu1 %405  ;;  %v388_v50 = vpop.permute.xlu0 %387 }
  0xa9   : > { %v396_v51 = vsel %vm395_vm7, %v388_v50, %v390_v41  ;;  %v410_v53 = vsel %vm407_vm2, %v404_v22, %v406_v49 }
  0xaa   : > { %v454_v54 = vsel %vm428_vm9, %v448_v52, %v396_v51  ;;  %v474_v55 = vsel %vm411_vm3, %v410_v53, 0 }
  0xab   : > { %489 = vmatpush1.bf16.msra.mxu0 %v454_v54  ;;  %753 = vmatpush3.bf16.msra.mxu1 %v474_v55 }
  0xac   : > { %v316_v56 = vpop.permute.xlu1 %315  ;;  %v314_v57 = vpop.permute.xlu0 %313  ;;  %754 = vmatprep.subr.bf16.mxu1 %v832_v17 }
  0xad   : > { %v321_v0 = vsel %vm319_vm10, %v314_v57, %v316_v56 }
  0xae   : > { %v417_v2 = vsel %vm411_vm3, %v912_v12, %v321_v0 }
  0xb0   : > { %v328_v58 = vpop.permute.xlu1 %327  ;;  %v312_v59 = vpop.permute.xlu0 %311 }
  0xb1   : > { %v320_v6 = vsel %vm319_vm10, %v312_v59, %v314_v57 }
  0xb2   : > { %v414_v14 = vsel %vm411_vm3, %v904_v10, %v320_v6  ;;  %v462_v10 = vld [vmem:[%s1037_s1] sm:$0xf] }
  0xb4   : > { %v358_v60 = vpop.permute.xlu1 %357  ;;  %v330_v61 = vpop.permute.xlu0 %329 }
  0xb5   : > { %v335_v1 = vsel %vm333_vm11, %v328_v58, %v330_v61  ;;  %v362_v22 = vsel %vm359_vm6, %v948_v23, %v358_v60 }
  0xb6   : > { %v425_v8 = vsel %vm421_vm8, %v417_v2, %v335_v1 }
  0xb8   : > { %v326_v62 = vpop.permute.xlu1 %325  ;;  %v370_v63 = vpop.permute.xlu0 %369 }
  0xb9   : > { %v334_v9 = vsel %vm333_vm11, %v326_v62, %v328_v58  ;;  %v374_v12 = vsel %vm371_vm4, %v368_v30, %v370_v63  ;;  %v600_v63 = vld [vmem:[%s1041_s5] sm:$0xff] }
  0xba   : > { %v423_v19 = vsel %vm421_vm8, %v414_v14, %v334_v9  ;;  %v446_v24 = vsel %vm411_vm3, %v362_v22, %v374_v12 }
  0xbc   : > { %v343_v3 = vpop.permute.xlu1 %342  ;;  %v341_v4 = vpop.permute.xlu0 %340 }
  0xbd   : > { %v348_v7 = vsel %vm346_vm12, %v341_v4, %v343_v3 }
  0xbe   : > { %v433_v13 = vsel %vm428_vm9, %v425_v8, %v348_v7 }
  0xbf   : > { %490 = vmatprep.subr.bf16.mxu0 %v433_v13 }
  0xc0   : > { %v339_v15 = vpop.permute.xlu1 %338  ;;  %v382_v16 = vpop.permute.xlu0 %381 }
  0xc1   : > { %v347_v18 = vsel %vm346_vm12, %v339_v15, %v341_v4  ;;  %v386_v20 = vsel %vm383_vm5, %v380_v35, %v382_v16 }
  0xc2   : > { %v430_v21 = vsel %vm428_vm9, %v423_v19, %v347_v18  ;;  %v452_v28 = vsel %vm421_vm8, %v446_v24, %v386_v20 }
  0xc3   : > { %491 = vmatpush1.bf16.msra.mxu0 %v430_v21 }
  0xc4   : > { %v318_v25 = vpop.permute.xlu1 %317  ;;  %v394_v26 = vpop.permute.xlu0 %393 }
  0xc5   : > { %v398_v27 = vsel %vm395_vm7, %v392_v40, %v394_v26  ;;  %v322_v29 = vsel %vm319_vm10, %v316_v56, %v318_v25 }
  0xc6   : > { %738 = vmatmul.mubr.msk.bf16.vlgmr.msra.gmra.mxu0 %vm463_vm13, %v462_v10  ;;  %v460_v23 = vsel %vm428_vm9, %v452_v28, %v398_v27  ;;  %v420_v32 = vsel %vm411_vm3, %v906_v11, %v322_v29  ;;  %v572_v11 = vld [vmem:[%s1038_s2] sm:$0x7] }
  0xc7   : > { %755 = vmatpush3.bf16.msra.mxu1 %v460_v23  ;;  %v577_v39 = vrot.slane %v572_v11, %v576_v37  ;;  %v581_v40 = vrot.slane %v572_v11, %v580_v38  ;;  %v585_v48 = vrot.slane %v572_v11, %v584_v42 }
  0xc8   : > { %v345_v30 = vpop.permute.xlu1 %344  ;;  %v332_v31 = vpop.permute.xlu0 %331  ;;  %756 = vmatprep.subr.bf16.mxu1 %v832_v17 }
  0xc9   : > { %v349_v33 = vsel %vm346_vm12, %v343_v3, %v345_v30  ;;  %v336_v34 = vsel %vm333_vm11, %v330_v61, %v332_v31  ;;  %v592_v61 = vld [vmem:[%s1040_s4] sm:$0xff] }
  0xca   : > { %v427_v35 = vsel %vm421_vm8, %v420_v32, %v336_v34 }
  0xcb   : > { %v436_v36 = vsel %vm428_vm9, %v427_v35, %v349_v33 }
  0xcc   : > { %757 = vmatpush3.bf16.msra.mxu1 %v436_v36 }
  0xcf   : > { %759 = vmatmul.mubr.msk.bf16.vlgmr.msra.gmra.mxu1 %vm463_vm13, %v462_v10 }
 0x186   : > { %v510_v17 = vpop.f32.mrf.mxu0 }
 0x187   : > { %v589_v44 = vmul.f32 %v577_v39, %v510_v17 }
 0x188   : > { %v512_v41 = vpop.f32.mrf.mxu0 }
 0x189   : > { %v746_v43 = vpack.c.bf16 %v512_v41, %v510_v17  ;;  %v590_v45 = vmul.f32 %v581_v40, %v512_v41  ;;  %v601_v49 = vmul.f32 %v589_v44, %v510_v17 }
 0x18a   : > { %v514_v46 = vpop.f32.mrf.mxu0 }
 0x18b   : > { %570 = vst [vmem:[%s893_s29] sm:$0xff] %v746_v43  ;;  %v602_v50 = vmul.f32 %v590_v45, %v512_v41  ;;  %v593_v54 = vadd.f32 %v590_v45, %v589_v44 }
 0x18c   : > { %v515_v47 = vpop.f32.mrf.mxu0 }
 0x18d   : > { %v604_v58 = vadd.f32 %v602_v50, %v601_v49 }
 0x18f   : > { %v551_v51 = vpop.f32.mrf.mxu1 }
 0x190   : > { %v747_v52 = vpack.c.bf16 %v551_v51, %v551_v51  ;;  %v591_v53 = vmul.f32 %v585_v48, %v551_v51 }
 0x191   : > { %v760_v55 = vpop.f32.mrf.mxu1 }
 0x192   : > { %571 = vst [vmem:[%s893_s29 + $0x8] sm:$0xf] %v747_v52  ;;  %v594_v56 = vadd.f32 %v593_v54, %v591_v53  ;;  %v603_v57 = vmul.f32 %v591_v53, %v551_v51 }
 0x193   : > { %v554_v59 = vpop.f32.mrf.mxu1 }
 0x194   : > { %595 = vadd.xlane.f32.xlu0 %v594_v56  ;;  %v605_v5 = vadd.f32 %v604_v58, %v603_v57 }
 0x195   : > { %v761_v60 = vpop.f32.mrf.mxu1 }
 0x196   : > { %606 = vadd.xlane.f32.xlu1 %v605_v5 }
 0x21d   : > { %v596_v62 = vpop.xlane.xlu0 %595 }
 0x21e   : > { %v597_v0 = vadd.f32 %v596_v62, %v592_v61 }
 0x21f   : > { %v607_v1 = vpop.xlane.xlu1 %606 }
 0x220   : > { %599 = vst.msk [vmem:[%s1040_s4] sm:$0xff] %vm598_vm14, %v597_v0  ;;  %v608_v2 = vadd.f32 %v607_v1, %v600_v63 }
 0x222   : > { %609 = vst.msk [vmem:[%s1041_s5] sm:$0xff] %vm598_vm14, %v608_v2 }
 0x223 PF: > { %s16_s20 = sadd.s32 1, %s824_s20   ;;  %s1042_s18 = smov %s820_s19 }
 0x224   : > { %p13_p6 = scmp.ge.s32.totalorder %s16_s20, 4   ;;  %s1043_s19 = smov %s1045_s21 }
 0x226   :  { %15 = sbr.rel (!%p13_p6) target bundleno = 2 (0x2), region = 85 }

</bundles_post_ra>
